<compile_context>
chip_gen: v7x
topology: tpu7x:2x2x1
jax: 0.10.0
libtpu: 0.0.40
codegen_flags: <defaults>
</compile_context>

<pallas_src>
import functools

import jax
import jax.numpy as jnp
from jax.experimental import pallas as pl
from jax.experimental.pallas import tpu as pltpu


def _round_up(x, m):
    return (x + m - 1) // m * m


def mha_kernel(x_ref, y_ref, wq_ref, bq_ref, wk_ref, bk_ref, wv_ref, bv_ref,
               wp_ref, bp_ref, out_ref, attn_ref, *, num_heads, scale):
    C = wq_ref.shape[1]
    head_dim = C // num_heads

    x = x_ref[...]            # (tile_n, C)
    y = y_ref[...]            # (M, Dref)

    # Projections (MXU, f32 accumulation). Biases broadcast from (1, C) rows.
    q = jnp.dot(x, wq_ref[...], preferred_element_type=jnp.float32) + bq_ref[...]
    k = jnp.dot(y, wk_ref[...], preferred_element_type=jnp.float32) + bk_ref[...]
    v = jnp.dot(y, wv_ref[...], preferred_element_type=jnp.float32) + bv_ref[...]

    # Per-head attention via lane masks (keeps everything lane-dense; no 8-wide
    # lane slicing or concatenation inside the kernel).
    col = jax.lax.broadcasted_iota(jnp.int32, (1, C), 1)
    out_acc = jnp.zeros((x.shape[0], C), jnp.float32)
    for h in range(num_heads):
        mask = (col >= h * head_dim) & (col < (h + 1) * head_dim)   # (1, C)
        qh = jnp.where(mask, q, 0.0)
        kh = jnp.where(mask, k, 0.0)
        vh = jnp.where(mask, v, 0.0)

        # Masked-out columns are zero in BOTH operands, so this equals the
        # per-head (tile_n, d) x (d, M) score matrix.
        s = jnp.dot(qh, kh.T, preferred_element_type=jnp.float32) * scale   # (tile_n, M)
        s = s - jnp.max(s, axis=-1, keepdims=True)
        p = jnp.exp(s)
        p = p / jnp.sum(p, axis=-1, keepdims=True)
        attn_ref[h, :, :] = p.astype(attn_ref.dtype)

        # Only this head's columns of vh are nonzero, so summing over heads
        # reconstructs the concatenated (tile_n, C) attention output directly.
        out_acc = out_acc + jnp.dot(p, vh, preferred_element_type=jnp.float32)

    # Output projection. Dropout has p=0.0 -> identity.
    out = jnp.dot(out_acc, wp_ref[...], preferred_element_type=jnp.float32) + bp_ref[...]
    out_ref[...] = out.astype(out_ref.dtype)
    # TODO(synk): optional `mask` argument (masked_fill with -inf before softmax) is not
    # implemented; the module's default mask=None path is what this kernel computes.


def multi_head_attention_pallas(x, y, wq, bq, wkv, bkv, wp, bp, *,
                                num_heads, tile_n=128):
    """x: (B, N, C) [dim_self], y: (B, M, Dref) [dim_ref].

    Returns (out: (B, N, C), attention: (B, N, M, num_heads)) matching the torch module.
    """
    B, N, C = x.shape
    _, M, Dref = y.shape
    assert C % num_heads == 0
    head_dim = C // num_heads
    scale = head_dim ** -0.5

    # Split fused to_keys_values weight/bias into K / V halves in the wrapper (free in XLA).
    wk, wv = wkv[:, :C], wkv[:, C:]
    bk, bv = bkv[:C], bkv[C:]

    # Row tiling with padded tail: pick a big, 8-aligned tile regardless of N.
    tile_n = max(8, min(tile_n, _round_up(N, 8)))
    n_pad = _round_up(N, tile_n)
    x_p = jnp.pad(x, ((0, 0), (0, n_pad - N), (0, 0))) if n_pad != N else x

    grid = (B, n_pad // tile_n)

    flops = 2 * B * (n_pad * C * C                     # q projection
                     + 2 * M * Dref * C                # k / v projections
                     + 2 * num_heads * n_pad * M * C   # scores + att@v
                     + n_pad * C * C)                  # output projection
    bytes_accessed = 4 * (x_p.size + y.size + wq.size + wkv.size + wp.size
                          + B * n_pad * C + B * num_heads * n_pad * M)
    cost = pl.CostEstimate(flops=int(flops),
                           transcendentals=int(B * num_heads * n_pad * M),
                           bytes_accessed=int(bytes_accessed))

    kernel = functools.partial(mha_kernel, num_heads=num_heads, scale=scale)

    out, attn = pl.pallas_call(
        kernel,
        out_shape=(
            jax.ShapeDtypeStruct((B, n_pad, C), x.dtype),
            jax.ShapeDtypeStruct((B, num_heads, n_pad, M), jnp.float32),
        ),
        grid_spec=pltpu.PrefetchScalarGridSpec(
            num_scalar_prefetch=0,
            grid=grid,
            in_specs=[
                pl.BlockSpec((None, tile_n, C), lambda b, i: (b, i, 0)),   # x q-tile
                pl.BlockSpec((None, M, Dref), lambda b, i: (b, 0, 0)),     # y (full, per batch)
                pl.BlockSpec((C, C), lambda b, i: (0, 0)),                 # Wq   (resident)
                pl.BlockSpec((1, C), lambda b, i: (0, 0)),                 # bq
                pl.BlockSpec((Dref, C), lambda b, i: (0, 0)),              # Wk   (resident)
                pl.BlockSpec((1, C), lambda b, i: (0, 0)),                 # bk
                pl.BlockSpec((Dref, C), lambda b, i: (0, 0)),              # Wv   (resident)
                pl.BlockSpec((1, C), lambda b, i: (0, 0)),                 # bv
                pl.BlockSpec((C, C), lambda b, i: (0, 0)),                 # Wp   (resident)
                pl.BlockSpec((1, C), lambda b, i: (0, 0)),                 # bp
            ],
            out_specs=(
                pl.BlockSpec((None, tile_n, C), lambda b, i: (b, i, 0)),
                pl.BlockSpec((None, num_heads, tile_n, M), lambda b, i: (b, 0, i, 0)),
            ),
        ),
        compiler_params=pltpu.CompilerParams(
            dimension_semantics=("parallel", "parallel"),
        ),
        cost_estimate=cost,
    )(x_p, y, wq, bq.reshape(1, C), wk, bk.reshape(1, C),
      wv, bv.reshape(1, C), wp, bp.reshape(1, C))

    out = out[:, :N, :]
    attn = jnp.transpose(attn[:, :, :N, :], (0, 2, 3, 1))   # (B, N, M, H) like the module
    return out, attn


def init_params(key, dim_self, dim_ref, dtype=jnp.float32):
    """nn.Linear-style init: uniform(-1/sqrt(fan_in), +1/sqrt(fan_in))."""
    ks = jax.random.split(key, 6)
    b_self = 1.0 / dim_self ** 0.5
    b_ref = 1.0 / dim_ref ** 0.5
    wq = jax.random.uniform(ks[0], (dim_self, dim_self), dtype, -b_self, b_self)
    bq = jax.random.uniform(ks[1], (dim_self,), dtype, -b_self, b_self)
    wkv = jax.random.uniform(ks[2], (dim_ref, 2 * dim_self), dtype, -b_ref, b_ref)
    bkv = jax.random.uniform(ks[3], (2 * dim_self,), dtype, -b_ref, b_ref)
    wp = jax.random.uniform(ks[4], (dim_self, dim_self), dtype, -b_self, b_self)
    bp = jax.random.uniform(ks[5], (dim_self,), dtype, -b_self, b_self)
    return wq, bq, wkv, bkv, wp, bp


def reference_mha(x, y, wq, bq, wkv, bkv, wp, bp, num_heads):
    """Pure-JAX mirror of the torch forward (mask=None)."""
    b, n, c = x.shape
    _, m, _ = y.shape
    d = c // num_heads
    scale = d ** -0.5
    hp = jax.lax.Precision.HIGHEST
    q = (jnp.matmul(x, wq, precision=hp) + bq).reshape(b, n, num_heads, d)
    kv = (jnp.matmul(y, wkv, precision=hp) + bkv).reshape(b, m, 2, num_heads, d)
    k, v = kv[:, :, 0], kv[:, :, 1]
    att = jnp.einsum('bnhd,bmhd->bnmh', q, k, precision=hp) * scale
    att = jax.nn.softmax(att, axis=2)
    out = jnp.einsum('bnmh,bmhd->bnhd', att, v, precision=hp).reshape(b, n, c)
    out = jnp.matmul(out, wp, precision=hp) + bp
    return out, att


if __name__ == "__main__":
    # Small shapes consistent with the module: batch=2, seq=8, dim_self=dim_ref=32, 4 heads.
    B, N, C = 2, 8, 32
    num_heads = 4

    key = jax.random.PRNGKey(0)
    kx, kp = jax.random.split(key)
    x = jax.random.normal(kx, (B, N, C), jnp.float32)
    wq, bq, wkv, bkv, wp, bp = init_params(kp, C, C)

    out, attn = multi_head_attention_pallas(x, x, wq, bq, wkv, bkv, wp, bp,
                                            num_heads=num_heads)
    out = jax.block_until_ready(out)
    attn = jax.block_until_ready(attn)

    ref_out, ref_attn = reference_mha(x, x, wq, bq, wkv, bkv, wp, bp, num_heads)

    assert out.shape == (B, N, C)
    assert attn.shape == (B, N, N, num_heads)
    assert jnp.allclose(out, ref_out, atol=2e-4, rtol=2e-4), "output mismatch vs reference"
    assert jnp.allclose(attn, ref_attn, atol=2e-4, rtol=2e-4), "attention mismatch vs reference"

    print("KERNEL_OK")
</pallas_src>

<mosaic_0001>
module attributes {stable_mosaic.version = 11 : i64} {
  func.func @mha_kernel(%arg0: i32, %arg1: i32, %arg2: memref<1x8x32xf32, #tpu.memory_space<vmem>>, %arg3: memref<1x8x32xf32, #tpu.memory_space<vmem>>, %arg4: memref<32x32xf32, #tpu.memory_space<vmem>>, %arg5: memref<1x32xf32, #tpu.memory_space<vmem>>, %arg6: memref<32x32xf32, #tpu.memory_space<vmem>>, %arg7: memref<1x32xf32, #tpu.memory_space<vmem>>, %arg8: memref<32x32xf32, #tpu.memory_space<vmem>>, %arg9: memref<1x32xf32, #tpu.memory_space<vmem>>, %arg10: memref<32x32xf32, #tpu.memory_space<vmem>>, %arg11: memref<1x32xf32, #tpu.memory_space<vmem>>, %arg12: memref<1x8x32xf32, #tpu.memory_space<vmem>>, %arg13: memref<1x4x8x8xf32, #tpu.memory_space<vmem>>) attributes {dimension_semantics = [#tpu.dimension_semantics<parallel>, #tpu.dimension_semantics<parallel>], iteration_bounds = array<i64: 2, 1>, scalar_prefetch = 0 : i64, scratch_operands = 0 : i64, tpu.core_type = #tpu.core_type<tc>, window_params = [{transform_indices = @transform_0, window_bounds = array<i64: 1, 8, 32>}, {transform_indices = @transform_1, window_bounds = array<i64: 1, 8, 32>}, {pipeline_mode = #tpu.pipeline_mode<synchronous>, transform_indices = @transform_2, window_bounds = array<i64: 32, 32>}, {pipeline_mode = #tpu.pipeline_mode<synchronous>, transform_indices = @transform_3, window_bounds = array<i64: 1, 32>}, {pipeline_mode = #tpu.pipeline_mode<synchronous>, transform_indices = @transform_4, window_bounds = array<i64: 32, 32>}, {pipeline_mode = #tpu.pipeline_mode<synchronous>, transform_indices = @transform_5, window_bounds = array<i64: 1, 32>}, {pipeline_mode = #tpu.pipeline_mode<synchronous>, transform_indices = @transform_6, window_bounds = array<i64: 32, 32>}, {pipeline_mode = #tpu.pipeline_mode<synchronous>, transform_indices = @transform_7, window_bounds = array<i64: 1, 32>}, {pipeline_mode = #tpu.pipeline_mode<synchronous>, transform_indices = @transform_8, window_bounds = array<i64: 32, 32>}, {pipeline_mode = #tpu.pipeline_mode<synchronous>, transform_indices = @transform_9, window_bounds = array<i64: 1, 32>}, {transform_indices = @transform_10, window_bounds = array<i64: 1, 8, 32>}, {transform_indices = @transform_11, window_bounds = array<i64: 1, 4, 8, 8>}]} {
    %c0 = arith.constant 0 : index
    %c0_0 = arith.constant 0 : index
    %c0_1 = arith.constant 0 : index
    %0 = vector.load %arg2[%c0, %c0_0, %c0_1] : memref<1x8x32xf32, #tpu.memory_space<vmem>>, vector<1x8x32xf32>
    %1 = vector.shape_cast %0 : vector<1x8x32xf32> to vector<8x32xf32>
    %c0_2 = arith.constant 0 : index
    %c0_3 = arith.constant 0 : index
    %c0_4 = arith.constant 0 : index
    %2 = vector.load %arg3[%c0_2, %c0_3, %c0_4] : memref<1x8x32xf32, #tpu.memory_space<vmem>>, vector<1x8x32xf32>
    %3 = vector.shape_cast %2 : vector<1x8x32xf32> to vector<8x32xf32>
    %c0_5 = arith.constant 0 : index
    %c0_6 = arith.constant 0 : index
    %4 = vector.load %arg4[%c0_5, %c0_6] : memref<32x32xf32, #tpu.memory_space<vmem>>, vector<32x32xf32>
    %cst = arith.constant dense<0.000000e+00> : vector<8x32xf32>
    %5 = tpu.matmul %1, %4, %cst {dimension_numbers = #tpu.dot_dimension_numbers<[1], [0], [0], [1], [0, 0, 1, 1], [], []>} : vector<8x32xf32>, vector<32x32xf32>, vector<8x32xf32> -> vector<8x32xf32>
    %c0_7 = arith.constant 0 : index
    %c0_8 = arith.constant 0 : index
    %6 = vector.load %arg5[%c0_7, %c0_8] : memref<1x32xf32, #tpu.memory_space<vmem>>, vector<1x32xf32>
    %7 = vector.broadcast %6 : vector<1x32xf32> to vector<8x32xf32>
    %8 = arith.addf %5, %7 : vector<8x32xf32>
    %c0_9 = arith.constant 0 : index
    %c0_10 = arith.constant 0 : index
    %9 = vector.load %arg6[%c0_9, %c0_10] : memref<32x32xf32, #tpu.memory_space<vmem>>, vector<32x32xf32>
    %cst_11 = arith.constant dense<0.000000e+00> : vector<8x32xf32>
    %10 = tpu.matmul %3, %9, %cst_11 {dimension_numbers = #tpu.dot_dimension_numbers<[1], [0], [0], [1], [0, 0, 1, 1], [], []>} : vector<8x32xf32>, vector<32x32xf32>, vector<8x32xf32> -> vector<8x32xf32>
    %c0_12 = arith.constant 0 : index
    %c0_13 = arith.constant 0 : index
    %11 = vector.load %arg7[%c0_12, %c0_13] : memref<1x32xf32, #tpu.memory_space<vmem>>, vector<1x32xf32>
    %12 = vector.broadcast %11 : vector<1x32xf32> to vector<8x32xf32>
    %13 = arith.addf %10, %12 : vector<8x32xf32>
    %c0_14 = arith.constant 0 : index
    %c0_15 = arith.constant 0 : index
    %14 = vector.load %arg8[%c0_14, %c0_15] : memref<32x32xf32, #tpu.memory_space<vmem>>, vector<32x32xf32>
    %cst_16 = arith.constant dense<0.000000e+00> : vector<8x32xf32>
    %15 = tpu.matmul %3, %14, %cst_16 {dimension_numbers = #tpu.dot_dimension_numbers<[1], [0], [0], [1], [0, 0, 1, 1], [], []>} : vector<8x32xf32>, vector<32x32xf32>, vector<8x32xf32> -> vector<8x32xf32>
    %c0_17 = arith.constant 0 : index
    %c0_18 = arith.constant 0 : index
    %16 = vector.load %arg9[%c0_17, %c0_18] : memref<1x32xf32, #tpu.memory_space<vmem>>, vector<1x32xf32>
    %17 = vector.broadcast %16 : vector<1x32xf32> to vector<8x32xf32>
    %18 = arith.addf %15, %17 : vector<8x32xf32>
    %19 = tpu.iota {dimensions = array<i32: 1>} : vector<1x32xi32>
    %cst_19 = arith.constant 0.000000e+00 : f32
    %20 = vector.broadcast %cst_19 : f32 to vector<8x32xf32>
    %c0_i32 = arith.constant 0 : i32
    %21 = vector.broadcast %c0_i32 : i32 to vector<1x32xi32>
    %22 = arith.cmpi sge, %19, %21 : vector<1x32xi32>
    %c8_i32 = arith.constant 8 : i32
    %23 = vector.broadcast %c8_i32 : i32 to vector<1x32xi32>
    %24 = arith.cmpi slt, %19, %23 : vector<1x32xi32>
    %25 = arith.andi %22, %24 : vector<1x32xi1>
    %cst_20 = arith.constant 0.000000e+00 : f32
    %26 = vector.shape_cast %25 : vector<1x32xi1> to vector<1x32xi1>
    %27 = vector.broadcast %26 : vector<1x32xi1> to vector<8x32xi1>
    %28 = vector.broadcast %cst_20 : f32 to vector<8x32xf32>
    %29 = arith.select %27, %8, %28 : vector<8x32xi1>, vector<8x32xf32>
    %cst_21 = arith.constant 0.000000e+00 : f32
    %30 = vector.shape_cast %25 : vector<1x32xi1> to vector<1x32xi1>
    %31 = vector.broadcast %30 : vector<1x32xi1> to vector<8x32xi1>
    %32 = vector.broadcast %cst_21 : f32 to vector<8x32xf32>
    %33 = arith.select %31, %13, %32 : vector<8x32xi1>, vector<8x32xf32>
    %cst_22 = arith.constant 0.000000e+00 : f32
    %34 = vector.shape_cast %25 : vector<1x32xi1> to vector<1x32xi1>
    %35 = vector.broadcast %34 : vector<1x32xi1> to vector<8x32xi1>
    %36 = vector.broadcast %cst_22 : f32 to vector<8x32xf32>
    %37 = arith.select %35, %18, %36 : vector<8x32xi1>, vector<8x32xf32>
    %38 = tpu.transpose %33, [1, 0] : vector<8x32xf32> -> vector<32x8xf32>
    %cst_23 = arith.constant dense<0.000000e+00> : vector<8x8xf32>
    %39 = tpu.matmul %29, %38, %cst_23 {dimension_numbers = #tpu.dot_dimension_numbers<[1], [0], [0], [1], [0, 0, 1, 1], [], []>} : vector<8x32xf32>, vector<32x8xf32>, vector<8x8xf32> -> vector<8x8xf32>
    %cst_24 = arith.constant 0.353553385 : f32
    %40 = vector.broadcast %cst_24 : f32 to vector<8x8xf32>
    %41 = arith.mulf %39, %40 : vector<8x8xf32>
    %cst_25 = arith.constant dense<0xFF800000> : vector<8xf32>
    %42 = vector.multi_reduction <maximumf>, %41, %cst_25 [1] : vector<8x8xf32> to vector<8xf32>
    %43 = vector.shape_cast %42 : vector<8xf32> to vector<8x1xf32>
    %44 = vector.broadcast %43 : vector<8x1xf32> to vector<8x8xf32>
    %45 = arith.subf %41, %44 : vector<8x8xf32>
    %46 = math.exp %45 : vector<8x8xf32>
    %cst_26 = arith.constant dense<0.000000e+00> : vector<8xf32>
    %47 = vector.multi_reduction <add>, %46, %cst_26 [1] : vector<8x8xf32> to vector<8xf32>
    %48 = vector.shape_cast %47 : vector<8xf32> to vector<8x1xf32>
    %49 = vector.broadcast %48 : vector<8x1xf32> to vector<8x8xf32>
    %50 = arith.divf %46, %49 : vector<8x8xf32>
    %c0_27 = arith.constant 0 : index
    %c0_28 = arith.constant 0 : index
    %c0_29 = arith.constant 0 : index
    %c0_30 = arith.constant 0 : index
    %51 = vector.load %arg13[%c0_27, %c0_28, %c0_29, %c0_30] : memref<1x4x8x8xf32, #tpu.memory_space<vmem>>, vector<1x1x8x8xf32>
    %52 = vector.shape_cast %51 : vector<1x1x8x8xf32> to vector<8x8xf32>
    %53 = vector.shape_cast %50 : vector<8x8xf32> to vector<1x1x8x8xf32>
    tpu.vector_store %arg13[%c0_27, %c0_28, %c0_29, %c0_30], %53 {strides = array<i32>} : memref<1x4x8x8xf32, #tpu.memory_space<vmem>>, vector<1x1x8x8xf32>,
    %cst_31 = arith.constant dense<0.000000e+00> : vector<8x32xf32>
    %54 = tpu.matmul %50, %37, %cst_31 {dimension_numbers = #tpu.dot_dimension_numbers<[1], [0], [0], [1], [0, 0, 1, 1], [], []>} : vector<8x8xf32>, vector<8x32xf32>, vector<8x32xf32> -> vector<8x32xf32>
    %55 = arith.addf %20, %54 : vector<8x32xf32>
    %c8_i32_32 = arith.constant 8 : i32
    %56 = vector.broadcast %c8_i32_32 : i32 to vector<1x32xi32>
    %57 = arith.cmpi sge, %19, %56 : vector<1x32xi32>
    %c16_i32 = arith.constant 16 : i32
    %58 = vector.broadcast %c16_i32 : i32 to vector<1x32xi32>
    %59 = arith.cmpi slt, %19, %58 : vector<1x32xi32>
    %60 = arith.andi %57, %59 : vector<1x32xi1>
    %cst_33 = arith.constant 0.000000e+00 : f32
    %61 = vector.shape_cast %60 : vector<1x32xi1> to vector<1x32xi1>
    %62 = vector.broadcast %61 : vector<1x32xi1> to vector<8x32xi1>
    %63 = vector.broadcast %cst_33 : f32 to vector<8x32xf32>
    %64 = arith.select %62, %8, %63 : vector<8x32xi1>, vector<8x32xf32>
    %cst_34 = arith.constant 0.000000e+00 : f32
    %65 = vector.shape_cast %60 : vector<1x32xi1> to vector<1x32xi1>
    %66 = vector.broadcast %65 : vector<1x32xi1> to vector<8x32xi1>
    %67 = vector.broadcast %cst_34 : f32 to vector<8x32xf32>
    %68 = arith.select %66, %13, %67 : vector<8x32xi1>, vector<8x32xf32>
    %cst_35 = arith.constant 0.000000e+00 : f32
    %69 = vector.shape_cast %60 : vector<1x32xi1> to vector<1x32xi1>
    %70 = vector.broadcast %69 : vector<1x32xi1> to vector<8x32xi1>
    %71 = vector.broadcast %cst_35 : f32 to vector<8x32xf32>
    %72 = arith.select %70, %18, %71 : vector<8x32xi1>, vector<8x32xf32>
    %73 = tpu.transpose %68, [1, 0] : vector<8x32xf32> -> vector<32x8xf32>
    %cst_36 = arith.constant dense<0.000000e+00> : vector<8x8xf32>
    %74 = tpu.matmul %64, %73, %cst_36 {dimension_numbers = #tpu.dot_dimension_numbers<[1], [0], [0], [1], [0, 0, 1, 1], [], []>} : vector<8x32xf32>, vector<32x8xf32>, vector<8x8xf32> -> vector<8x8xf32>
    %cst_37 = arith.constant 0.353553385 : f32
    %75 = vector.broadcast %cst_37 : f32 to vector<8x8xf32>
    %76 = arith.mulf %74, %75 : vector<8x8xf32>
    %cst_38 = arith.constant dense<0xFF800000> : vector<8xf32>
    %77 = vector.multi_reduction <maximumf>, %76, %cst_38 [1] : vector<8x8xf32> to vector<8xf32>
    %78 = vector.shape_cast %77 : vector<8xf32> to vector<8x1xf32>
    %79 = vector.broadcast %78 : vector<8x1xf32> to vector<8x8xf32>
    %80 = arith.subf %76, %79 : vector<8x8xf32>
    %81 = math.exp %80 : vector<8x8xf32>
    %cst_39 = arith.constant dense<0.000000e+00> : vector<8xf32>
    %82 = vector.multi_reduction <add>, %81, %cst_39 [1] : vector<8x8xf32> to vector<8xf32>
    %83 = vector.shape_cast %82 : vector<8xf32> to vector<8x1xf32>
    %84 = vector.broadcast %83 : vector<8x1xf32> to vector<8x8xf32>
    %85 = arith.divf %81, %84 : vector<8x8xf32>
    %c0_40 = arith.constant 0 : index
    %c1 = arith.constant 1 : index
    %c0_41 = arith.constant 0 : index
    %c0_42 = arith.constant 0 : index
    %86 = vector.load %arg13[%c0_40, %c1, %c0_41, %c0_42] : memref<1x4x8x8xf32, #tpu.memory_space<vmem>>, vector<1x1x8x8xf32>
    %87 = vector.shape_cast %86 : vector<1x1x8x8xf32> to vector<8x8xf32>
    %88 = vector.shape_cast %85 : vector<8x8xf32> to vector<1x1x8x8xf32>
    tpu.vector_store %arg13[%c0_40, %c1, %c0_41, %c0_42], %88 {strides = array<i32>} : memref<1x4x8x8xf32, #tpu.memory_space<vmem>>, vector<1x1x8x8xf32>,
    %cst_43 = arith.constant dense<0.000000e+00> : vector<8x32xf32>
    %89 = tpu.matmul %85, %72, %cst_43 {dimension_numbers = #tpu.dot_dimension_numbers<[1], [0], [0], [1], [0, 0, 1, 1], [], []>} : vector<8x8xf32>, vector<8x32xf32>, vector<8x32xf32> -> vector<8x32xf32>
    %90 = arith.addf %55, %89 : vector<8x32xf32>
    %c16_i32_44 = arith.constant 16 : i32
    %91 = vector.broadcast %c16_i32_44 : i32 to vector<1x32xi32>
    %92 = arith.cmpi sge, %19, %91 : vector<1x32xi32>
    %c24_i32 = arith.constant 24 : i32
    %93 = vector.broadcast %c24_i32 : i32 to vector<1x32xi32>
    %94 = arith.cmpi slt, %19, %93 : vector<1x32xi32>
    %95 = arith.andi %92, %94 : vector<1x32xi1>
    %cst_45 = arith.constant 0.000000e+00 : f32
    %96 = vector.shape_cast %95 : vector<1x32xi1> to vector<1x32xi1>
    %97 = vector.broadcast %96 : vector<1x32xi1> to vector<8x32xi1>
    %98 = vector.broadcast %cst_45 : f32 to vector<8x32xf32>
    %99 = arith.select %97, %8, %98 : vector<8x32xi1>, vector<8x32xf32>
    %cst_46 = arith.constant 0.000000e+00 : f32
    %100 = vector.shape_cast %95 : vector<1x32xi1> to vector<1x32xi1>
    %101 = vector.broadcast %100 : vector<1x32xi1> to vector<8x32xi1>
    %102 = vector.broadcast %cst_46 : f32 to vector<8x32xf32>
    %103 = arith.select %101, %13, %102 : vector<8x32xi1>, vector<8x32xf32>
    %cst_47 = arith.constant 0.000000e+00 : f32
    %104 = vector.shape_cast %95 : vector<1x32xi1> to vector<1x32xi1>
    %105 = vector.broadcast %104 : vector<1x32xi1> to vector<8x32xi1>
    %106 = vector.broadcast %cst_47 : f32 to vector<8x32xf32>
    %107 = arith.select %105, %18, %106 : vector<8x32xi1>, vector<8x32xf32>
    %108 = tpu.transpose %103, [1, 0] : vector<8x32xf32> -> vector<32x8xf32>
    %cst_48 = arith.constant dense<0.000000e+00> : vector<8x8xf32>
    %109 = tpu.matmul %99, %108, %cst_48 {dimension_numbers = #tpu.dot_dimension_numbers<[1], [0], [0], [1], [0, 0, 1, 1], [], []>} : vector<8x32xf32>, vector<32x8xf32>, vector<8x8xf32> -> vector<8x8xf32>
    %cst_49 = arith.constant 0.353553385 : f32
    %110 = vector.broadcast %cst_49 : f32 to vector<8x8xf32>
    %111 = arith.mulf %109, %110 : vector<8x8xf32>
    %cst_50 = arith.constant dense<0xFF800000> : vector<8xf32>
    %112 = vector.multi_reduction <maximumf>, %111, %cst_50 [1] : vector<8x8xf32> to vector<8xf32>
    %113 = vector.shape_cast %112 : vector<8xf32> to vector<8x1xf32>
    %114 = vector.broadcast %113 : vector<8x1xf32> to vector<8x8xf32>
    %115 = arith.subf %111, %114 : vector<8x8xf32>
    %116 = math.exp %115 : vector<8x8xf32>
    %cst_51 = arith.constant dense<0.000000e+00> : vector<8xf32>
    %117 = vector.multi_reduction <add>, %116, %cst_51 [1] : vector<8x8xf32> to vector<8xf32>
    %118 = vector.shape_cast %117 : vector<8xf32> to vector<8x1xf32>
    %119 = vector.broadcast %118 : vector<8x1xf32> to vector<8x8xf32>
    %120 = arith.divf %116, %119 : vector<8x8xf32>
    %c0_52 = arith.constant 0 : index
    %c2 = arith.constant 2 : index
    %c0_53 = arith.constant 0 : index
    %c0_54 = arith.constant 0 : index
    %121 = vector.load %arg13[%c0_52, %c2, %c0_53, %c0_54] : memref<1x4x8x8xf32, #tpu.memory_space<vmem>>, vector<1x1x8x8xf32>
    %122 = vector.shape_cast %121 : vector<1x1x8x8xf32> to vector<8x8xf32>
    %123 = vector.shape_cast %120 : vector<8x8xf32> to vector<1x1x8x8xf32>
    tpu.vector_store %arg13[%c0_52, %c2, %c0_53, %c0_54], %123 {strides = array<i32>} : memref<1x4x8x8xf32, #tpu.memory_space<vmem>>, vector<1x1x8x8xf32>,
    %cst_55 = arith.constant dense<0.000000e+00> : vector<8x32xf32>
    %124 = tpu.matmul %120, %107, %cst_55 {dimension_numbers = #tpu.dot_dimension_numbers<[1], [0], [0], [1], [0, 0, 1, 1], [], []>} : vector<8x8xf32>, vector<8x32xf32>, vector<8x32xf32> -> vector<8x32xf32>
    %125 = arith.addf %90, %124 : vector<8x32xf32>
    %c24_i32_56 = arith.constant 24 : i32
    %126 = vector.broadcast %c24_i32_56 : i32 to vector<1x32xi32>
    %127 = arith.cmpi sge, %19, %126 : vector<1x32xi32>
    %c32_i32 = arith.constant 32 : i32
    %128 = vector.broadcast %c32_i32 : i32 to vector<1x32xi32>
    %129 = arith.cmpi slt, %19, %128 : vector<1x32xi32>
    %130 = arith.andi %127, %129 : vector<1x32xi1>
    %cst_57 = arith.constant 0.000000e+00 : f32
    %131 = vector.shape_cast %130 : vector<1x32xi1> to vector<1x32xi1>
    %132 = vector.broadcast %131 : vector<1x32xi1> to vector<8x32xi1>
    %133 = vector.broadcast %cst_57 : f32 to vector<8x32xf32>
    %134 = arith.select %132, %8, %133 : vector<8x32xi1>, vector<8x32xf32>
    %cst_58 = arith.constant 0.000000e+00 : f32
    %135 = vector.shape_cast %130 : vector<1x32xi1> to vector<1x32xi1>
    %136 = vector.broadcast %135 : vector<1x32xi1> to vector<8x32xi1>
    %137 = vector.broadcast %cst_58 : f32 to vector<8x32xf32>
    %138 = arith.select %136, %13, %137 : vector<8x32xi1>, vector<8x32xf32>
    %cst_59 = arith.constant 0.000000e+00 : f32
    %139 = vector.shape_cast %130 : vector<1x32xi1> to vector<1x32xi1>
    %140 = vector.broadcast %139 : vector<1x32xi1> to vector<8x32xi1>
    %141 = vector.broadcast %cst_59 : f32 to vector<8x32xf32>
    %142 = arith.select %140, %18, %141 : vector<8x32xi1>, vector<8x32xf32>
    %143 = tpu.transpose %138, [1, 0] : vector<8x32xf32> -> vector<32x8xf32>
    %cst_60 = arith.constant dense<0.000000e+00> : vector<8x8xf32>
    %144 = tpu.matmul %134, %143, %cst_60 {dimension_numbers = #tpu.dot_dimension_numbers<[1], [0], [0], [1], [0, 0, 1, 1], [], []>} : vector<8x32xf32>, vector<32x8xf32>, vector<8x8xf32> -> vector<8x8xf32>
    %cst_61 = arith.constant 0.353553385 : f32
    %145 = vector.broadcast %cst_61 : f32 to vector<8x8xf32>
    %146 = arith.mulf %144, %145 : vector<8x8xf32>
    %cst_62 = arith.constant dense<0xFF800000> : vector<8xf32>
    %147 = vector.multi_reduction <maximumf>, %146, %cst_62 [1] : vector<8x8xf32> to vector<8xf32>
    %148 = vector.shape_cast %147 : vector<8xf32> to vector<8x1xf32>
    %149 = vector.broadcast %148 : vector<8x1xf32> to vector<8x8xf32>
    %150 = arith.subf %146, %149 : vector<8x8xf32>
    %151 = math.exp %150 : vector<8x8xf32>
    %cst_63 = arith.constant dense<0.000000e+00> : vector<8xf32>
    %152 = vector.multi_reduction <add>, %151, %cst_63 [1] : vector<8x8xf32> to vector<8xf32>
    %153 = vector.shape_cast %152 : vector<8xf32> to vector<8x1xf32>
    %154 = vector.broadcast %153 : vector<8x1xf32> to vector<8x8xf32>
    %155 = arith.divf %151, %154 : vector<8x8xf32>
    %c0_64 = arith.constant 0 : index
    %c3 = arith.constant 3 : index
    %c0_65 = arith.constant 0 : index
    %c0_66 = arith.constant 0 : index
    %156 = vector.load %arg13[%c0_64, %c3, %c0_65, %c0_66] : memref<1x4x8x8xf32, #tpu.memory_space<vmem>>, vector<1x1x8x8xf32>
    %157 = vector.shape_cast %156 : vector<1x1x8x8xf32> to vector<8x8xf32>
    %158 = vector.shape_cast %155 : vector<8x8xf32> to vector<1x1x8x8xf32>
    tpu.vector_store %arg13[%c0_64, %c3, %c0_65, %c0_66], %158 {strides = array<i32>} : memref<1x4x8x8xf32, #tpu.memory_space<vmem>>, vector<1x1x8x8xf32>,
    %cst_67 = arith.constant dense<0.000000e+00> : vector<8x32xf32>
    %159 = tpu.matmul %155, %142, %cst_67 {dimension_numbers = #tpu.dot_dimension_numbers<[1], [0], [0], [1], [0, 0, 1, 1], [], []>} : vector<8x8xf32>, vector<8x32xf32>, vector<8x32xf32> -> vector<8x32xf32>
    %160 = arith.addf %125, %159 : vector<8x32xf32>
    %c0_68 = arith.constant 0 : index
    %c0_69 = arith.constant 0 : index
    %161 = vector.load %arg10[%c0_68, %c0_69] : memref<32x32xf32, #tpu.memory_space<vmem>>, vector<32x32xf32>
    %cst_70 = arith.constant dense<0.000000e+00> : vector<8x32xf32>
    %162 = tpu.matmul %160, %161, %cst_70 {dimension_numbers = #tpu.dot_dimension_numbers<[1], [0], [0], [1], [0, 0, 1, 1], [], []>} : vector<8x32xf32>, vector<32x32xf32>, vector<8x32xf32> -> vector<8x32xf32>
    %c0_71 = arith.constant 0 : index
    %c0_72 = arith.constant 0 : index
    %163 = vector.load %arg11[%c0_71, %c0_72] : memref<1x32xf32, #tpu.memory_space<vmem>>, vector<1x32xf32>
    %164 = vector.broadcast %163 : vector<1x32xf32> to vector<8x32xf32>
    %165 = arith.addf %162, %164 : vector<8x32xf32>
    %c0_73 = arith.constant 0 : index
    %c0_74 = arith.constant 0 : index
    %c0_75 = arith.constant 0 : index
    %166 = vector.load %arg12[%c0_73, %c0_74, %c0_75] : memref<1x8x32xf32, #tpu.memory_space<vmem>>, vector<1x8x32xf32>
    %167 = vector.shape_cast %166 : vector<1x8x32xf32> to vector<8x32xf32>
    %168 = vector.shape_cast %165 : vector<8x32xf32> to vector<1x8x32xf32>
    tpu.vector_store %arg12[%c0_73, %c0_74, %c0_75], %168 {strides = array<i32>} : memref<1x8x32xf32, #tpu.memory_space<vmem>>, vector<1x8x32xf32>,
    return
  }
  func.func @transform_0(%arg0: i32, %arg1: i32) -> (i32, i32, i32) {
    %c0_i32 = arith.constant 0 : i32
    %c0_i32_0 = arith.constant 0 : i32
    return %arg0, %arg1, %c0_i32 : i32, i32, i32
  }
  func.func @transform_1(%arg0: i32, %arg1: i32) -> (i32, i32, i32) {
    %c0_i32 = arith.constant 0 : i32
    %c0_i32_0 = arith.constant 0 : i32
    %c0_i32_1 = arith.constant 0 : i32
    return %arg0, %c0_i32, %c0_i32_0 : i32, i32, i32
  }
  func.func @transform_2(%arg0: i32, %arg1: i32) -> (i32, i32) {
    %c0_i32 = arith.constant 0 : i32
    %c0_i32_0 = arith.constant 0 : i32
    %c0_i32_1 = arith.constant 0 : i32
    return %c0_i32, %c0_i32_0 : i32, i32
  }
  func.func @transform_3(%arg0: i32, %arg1: i32) -> (i32, i32) {
    %c0_i32 = arith.constant 0 : i32
    %c0_i32_0 = arith.constant 0 : i32
    %c0_i32_1 = arith.constant 0 : i32
    return %c0_i32, %c0_i32_0 : i32, i32
  }
  func.func @transform_4(%arg0: i32, %arg1: i32) -> (i32, i32) {
    %c0_i32 = arith.constant 0 : i32
    %c0_i32_0 = arith.constant 0 : i32
    %c0_i32_1 = arith.constant 0 : i32
    return %c0_i32, %c0_i32_0 : i32, i32
  }
  func.func @transform_5(%arg0: i32, %arg1: i32) -> (i32, i32) {
    %c0_i32 = arith.constant 0 : i32
    %c0_i32_0 = arith.constant 0 : i32
    %c0_i32_1 = arith.constant 0 : i32
    return %c0_i32, %c0_i32_0 : i32, i32
  }
  func.func @transform_6(%arg0: i32, %arg1: i32) -> (i32, i32) {
    %c0_i32 = arith.constant 0 : i32
    %c0_i32_0 = arith.constant 0 : i32
    %c0_i32_1 = arith.constant 0 : i32
    return %c0_i32, %c0_i32_0 : i32, i32
  }
  func.func @transform_7(%arg0: i32, %arg1: i32) -> (i32, i32) {
    %c0_i32 = arith.constant 0 : i32
    %c0_i32_0 = arith.constant 0 : i32
    %c0_i32_1 = arith.constant 0 : i32
    return %c0_i32, %c0_i32_0 : i32, i32
  }
  func.func @transform_8(%arg0: i32, %arg1: i32) -> (i32, i32) {
    %c0_i32 = arith.constant 0 : i32
    %c0_i32_0 = arith.constant 0 : i32
    %c0_i32_1 = arith.constant 0 : i32
    return %c0_i32, %c0_i32_0 : i32, i32
  }
  func.func @transform_9(%arg0: i32, %arg1: i32) -> (i32, i32) {
    %c0_i32 = arith.constant 0 : i32
    %c0_i32_0 = arith.constant 0 : i32
    %c0_i32_1 = arith.constant 0 : i32
    return %c0_i32, %c0_i32_0 : i32, i32
  }
  func.func @transform_10(%arg0: i32, %arg1: i32) -> (i32, i32, i32) {
    %c0_i32 = arith.constant 0 : i32
    %c0_i32_0 = arith.constant 0 : i32
    return %arg0, %arg1, %c0_i32 : i32, i32, i32
  }
  func.func @transform_11(%arg0: i32, %arg1: i32) -> (i32, i32, i32, i32) {
    %c0_i32 = arith.constant 0 : i32
    %c0_i32_0 = arith.constant 0 : i32
    %c0_i32_1 = arith.constant 0 : i32
    return %arg0, %c0_i32, %arg1, %c0_i32_0 : i32, i32, i32, i32
  }
}

</mosaic_0001>

<bundles_post_ra>
// kernel: tpu_custom_call.1
= control target key start
LH: loop header
LB: loop body
LE: loop exit
PB: predicated region body
PF: predicated region fallthrough
CT: control target
= control target key end

     0   :  { %s3005_s0 = inlined_call_operand.hbm [shape: f32[2,8,32], index: 0, kind: input, shape index: {}]   ;;  %s3006_s1 = inlined_call_operand.hbm [shape: f32[2,8,32], index: 1, kind: input, shape index: {}]   ;;  %s3007_s2 = inlined_call_operand.hbm [shape: f32[32,32], index: 2, kind: input, shape index: {}]   ;;  %s3008_s3 = inlined_call_operand.vmem [shape: f32[1,32], index: 3, kind: input, shape index: {}]   ;;  %s3009_s4 = inlined_call_operand.hbm [shape: f32[32,32], index: 4, kind: input, shape index: {}]   ;;  %s3010_s5 = inlined_call_operand.vmem [shape: f32[1,32], index: 5, kind: input, shape index: {}]   ;;  %s3011_s6 = inlined_call_operand.hbm [shape: f32[32,32], index: 6, kind: input, shape index: {}]   ;;  %s3012_s7 = inlined_call_operand.vmem [shape: f32[1,32], index: 7, kind: input, shape index: {}]   ;;  %s3013_s8 = inlined_call_operand.hbm [shape: f32[32,32], index: 8, kind: input, shape index: {}]   ;;  %s3014_s9 = inlined_call_operand.vmem [shape: f32[1,32], index: 9, kind: input, shape index: {}]   ;;  %s3015_s10 = inlined_call_operand.hbm [shape: f32[2,8,32], index: 10, kind: output, shape index: {0}]   ;;  %s3016_s11 = inlined_call_operand.hbm [shape: f32[2,4,8,8], index: 11, kind: output, shape index: {1}]  }
   0x1   :  { %3025 = sst [smem:[#allocation25_spill]] %s3007_s2 }
   0x2   :  { %3026 = sst [smem:[#allocation26_spill]] %s3009_s4 }
   0x3   :  { %3027 = sst [smem:[#allocation27_spill]] %s3011_s6 }
   0x4   :  { %3028 = sst [smem:[#allocation28_spill]] %s3012_s7 }
   0x5   :  { %3029 = sst [smem:[#allocation29_spill]] %s3013_s8 }
   0x6   :  { %3030 = sst [smem:[#allocation30_spill]] %s3014_s9 }
   0x7   :  { %3031 = sst [smem:[#allocation31_spill]] %s3015_s10 }
   0x8   :  { %3032 = sst [smem:[#allocation32_spill]] %s3016_s11 }
   0x9   :  { %17 = vsyncpa [#allocation3], 0 }
   0xa   :  { %19 = vsyncpa [#allocation3 + $0x1], 0 }
   0xb   :  { %20 = vsyncpa [#allocation6], 0 }
   0xc   :  { %22 = vsyncpa [#allocation6 + $0x1], 0 }
   0xd   :  { %23 = vsyncpa [#allocation9], 0 }
   0xe   :  { %24 = vsyncpa [#allocation12], 0 }
   0xf   :  { %25 = vsyncpa [#allocation4], 0 }
  0x10   :  { %27 = vsyncpa [#allocation4 + $0x1], 0 }
  0x11   :  { %28 = vsyncpa [#allocation15], 0 }
  0x12   :  { %30 = vsyncpa [#allocation15 + $0x1], 0  ;;  %s2485_s17 = smov 0   ;;  %s2487_s18 = smov 0  }
  0x13   :  { %s2489_s19 = smov 0   ;;  %s2491_s20 = smov 0  }
  0x14   :  { %s2493_s21 = smov 0   ;;  %s2495_s22 = smov 0  }
  0x15 LB: > { %3033 = sst [smem:[#allocation23_spill]] %s2400_s20  ;;  %s2516_s23 = sadd.s32 4294967295, %s2408_s22   ;;  %s2408_s22 = sphi %s2495_s22, %s36_s22   ;;  %s2404_s21 = sphi %s2493_s21, %s3075_s21   ;;  %s2400_s20 = sphi %s2491_s20, %s3074_s20   ;;  %s2396_s19 = sphi %s2489_s19, %s3073_s19   ;;  %s2392_s18 = sphi %s2487_s18, %s3072_s18   ;;  %s2388_s17 = sphi %s2485_s17, %s3071_s17  }
  0x16   : > { %p1766_p0 = scmp.ge.s32.totalorder %s2408_s22, 1  ;;  %p3020_p1 = scmp.eq.s32.totalorder %s2516_s23, 0 }
  0x17   : > { %p331_p2 = scmp.lt.s32.totalorder %s2408_s22, 3  ;;  %s2410_s25 = smov [#allocation7]  }
  0x18   : > { %s343_s26 = sshll.u32 %s2410_s25, 4  ;;  %s2411_s28 = smov [#allocation8]   ;;  %s2525_s26 = int_to_ptr.vmem [resolvable:$true] %s343_s26 }
  0x19   : > { %p2521_p3 = pnand %p1766_p0, %p331_p2  ;;  %s359_s29 = sshll.u32 %s2411_s28, 4  ;;  %s2536_s29 = int_to_ptr.vmem [resolvable:$true] %s359_s29 }
  0x1a   : > { %s2412_s30 = smov [#allocation10]   ;;  %s3036_s2 = sld [smem:[#allocation25_spill]] }
  0x1b   : > { %s3034_s24 = scalar_select %p2521_p3, 1, 0 }
  0x1c   : > { %p1994_p4 = pneg %p2521_p3  ;;  %s2538_s12 = sshll.u32 %s2412_s30, 4  ;;  %s376_s12 = int_to_ptr.vmem [resolvable:$true] %s2538_s12 }
  0x1e   : > { %p2532_p6 = pnand %p1994_p4, %p3020_p1 }
  0x20   : > { %s2106_s15 = scalar_lea.hbm %s3036_s2, 512  ;;  %p2548_p8 = pneg %p2532_p6 }
  0x21   : > { %p2107_p7 = scmp.ne.s32.totalorder %s3036_s2, %s2106_s15  ;;  %p2113_p11 = scmp.lt.u32.totalorder %s2106_s15, %s3036_s2 }
  0x23   : > { %p2109_p9 = pnand %p2548_p8, %p2107_p7 }
  0x25   : > { %p2110_p10 = pneg %p2109_p9 }
  0x27   : > { %p2115_p12 = pnand %p2113_p11, %p2110_p10 }
  0x29   : > { %2118 = shalt.err (!%p2115_p12)
}
  0x2a   : > { %s2119_s13 = scalar_lea.vmem %s2525_s26, 512  ;;  %p2127_p4 = scmp.lt.s32.totalorder %s2525_s26, %s2525_s26 }
  0x2b   : > { %p2120_p13 = scmp.ne.s32.totalorder %s2525_s26, %s2119_s13  ;;  %p2128_p5 = scmp.lt.s32.totalorder %s2119_s13, %s2119_s13 }
  0x2d   : > { %p2122_p0 = pnand %p2120_p13, %p2548_p8  ;;  %p2129_p7 = por %p2128_p5, %p2127_p4 }
  0x2f   : > { %p2123_p2 = pneg %p2122_p0 }
  0x31   : > { %p2130_p9 = pnand %p2129_p7, %p2123_p2 }
  0x33   : > { %2133 = shalt.err (!%p2130_p9)
}
  0x34   : > { %s2413_s14 = smov 128   ;;  %s2414_s15 = smov 8  }
  0x35   : > { %1997 = dma.hbm_to_vmem [thread:$0]  (!%p2532_p6), %s3036_s2, 512, %s2525_s26, [#allocation6], %s2413_s14, %s2413_s14, %s2414_s15  }
  0x36   : > { %s3038_s4 = sld [smem:[#allocation26_spill]] }
  0x3c   : > { %s2134_s13 = scalar_lea.hbm %s3038_s4, 512 }
  0x3d   : > { %p2135_p5 = scmp.ne.s32.totalorder %s3038_s4, %s2134_s13  ;;  %p2141_p12 = scmp.lt.u32.totalorder %s2134_s13, %s3038_s4 }
  0x3f   : > { %p2137_p10 = pnand %p2135_p5, %p2548_p8 }
  0x41   : > { %p2138_p11 = pneg %p2137_p10 }
  0x43   : > { %p2143_p13 = pnand %p2141_p12, %p2138_p11 }
  0x45   : > { %2146 = shalt.err (!%p2143_p13)
}
  0x46   : > { %s2147_s26 = scalar_lea.vmem %s2536_s29, 512  ;;  %p2155_p7 = scmp.lt.s32.totalorder %s2536_s29, %s2536_s29 }
  0x47   : > { %p2148_p0 = scmp.ne.s32.totalorder %s2536_s29, %s2147_s26  ;;  %p2156_p9 = scmp.lt.s32.totalorder %s2147_s26, %s2147_s26 }
  0x49   : > { %p2150_p2 = pnand %p2148_p0, %p2548_p8  ;;  %p2157_p5 = por %p2156_p9, %p2155_p7 }
  0x4b   : > { %p2151_p4 = pneg %p2150_p2 }
  0x4d   : > { %p2158_p10 = pnand %p2157_p5, %p2151_p4 }
  0x4f   : > { %2161 = shalt.err (!%p2158_p10)
}
  0x50   : > { %2000 = dma.hbm_to_vmem [thread:$0]  (!%p2532_p6), %s3038_s4, 512, %s2536_s29, [#allocation9], %s2413_s14, %s2413_s14, %s2414_s15  }
  0x51   : > { %s3039_s6 = sld [smem:[#allocation27_spill]] }
  0x57   : > { %s2162_s16 = scalar_lea.hbm %s3039_s6, 512 }
  0x58   : > { %p2163_p11 = scmp.ne.s32.totalorder %s3039_s6, %s2162_s16  ;;  %p2169_p0 = scmp.lt.u32.totalorder %s2162_s16, %s3039_s6 }
  0x5a   : > { %p2165_p12 = pnand %p2163_p11, %p2548_p8 }
  0x5c   : > { %p2166_p13 = pneg %p2165_p12 }
  0x5e   : > { %p2171_p2 = pnand %p2169_p0, %p2166_p13 }
  0x60   : > { %2174 = shalt.err (!%p2171_p2)
}
  0x61   : > { %s2175_s26 = scalar_lea.vmem %s376_s12, 512  ;;  %p2183_p5 = scmp.lt.s32.totalorder %s376_s12, %s376_s12 }
  0x62   : > { %p2176_p4 = scmp.ne.s32.totalorder %s376_s12, %s2175_s26  ;;  %p2184_p10 = scmp.lt.s32.totalorder %s2175_s26, %s2175_s26 }
  0x64   : > { %p2178_p7 = pnand %p2176_p4, %p2548_p8  ;;  %p2185_p1 = por %p2184_p10, %p2183_p5 }
  0x66   : > { %p2179_p9 = pneg %p2178_p7 }
  0x68   : > { %p2186_p3 = pnand %p2185_p1, %p2179_p9 }
  0x6a   : > { %2189 = shalt.err (!%p2186_p3)
}
  0x6b   : > { %2003 = dma.hbm_to_vmem [thread:$0]  (!%p2532_p6), %s3039_s6, 512, %s376_s12, [#allocation9], %s2413_s14, %s2413_s14, %s2414_s15  }
  0x6c   : > { %s2415_s9 = smov [#allocation11]   ;;  %s3040_s8 = sld [smem:[#allocation29_spill]] }
  0x6d   : > { %s391_s11 = sshll.u32 %s2415_s9, 4  ;;  %s392_s11 = int_to_ptr.vmem [resolvable:$true] %s391_s11 }
  0x72   : > { %s2190_s25 = scalar_lea.hbm %s3040_s8, 512 }
  0x73   : > { %p2191_p1 = scmp.ne.s32.totalorder %s3040_s8, %s2190_s25  ;;  %p2197_p12 = scmp.lt.u32.totalorder %s2190_s25, %s3040_s8 }
  0x75   : > { %p2193_p3 = pnand %p2191_p1, %p2548_p8 }
  0x77   : > { %p2194_p11 = pneg %p2193_p3 }
  0x79   : > { %p2199_p13 = pnand %p2197_p12, %p2194_p11 }
  0x7b   : > { %2202 = shalt.err (!%p2199_p13)
}
  0x7c   : > { %s2203_s12 = scalar_lea.vmem %s392_s11, 512  ;;  %p2211_p7 = scmp.lt.s32.totalorder %s392_s11, %s392_s11 }
  0x7d   : > { %p2204_p0 = scmp.ne.s32.totalorder %s392_s11, %s2203_s12  ;;  %p2212_p9 = scmp.lt.s32.totalorder %s2203_s12, %s2203_s12 }
  0x7f   : > { %p2206_p2 = pnand %p2204_p0, %p2548_p8  ;;  %p2213_p5 = por %p2212_p9, %p2211_p7 }
  0x81   : > { %p2207_p4 = pneg %p2206_p2 }
  0x83   : > { %p2214_p10 = pnand %p2213_p5, %p2207_p4 }
  0x85   : > { %2217 = shalt.err (!%p2214_p10)
}
  0x86   : > { %2006 = dma.hbm_to_vmem [thread:$0]  (!%p2532_p6), %s3040_s8, 512, %s392_s11, [#allocation12], %s2413_s14, %s2413_s14, %s2414_s15  }
  0x87   : > { %s1765_s10 = sadd.s32 4294967294, %s2408_s22   ;;  %s48_s27 = sadd.s32 1, %s2404_s21 }
  0x88   : > { %p50_p8 = scmp.ge.s32.totalorder %s48_s27, 2  ;;  %s57_s9 = sadd.s32 1, %s2396_s19 }
  0x89   : > { %p64_p1 = scmp.ne.s32.totalorder %s2396_s19, %s2392_s18  ;;  %p65_p3 = scmp.eq.s32.totalorder %s2408_s22, 0 }
  0x8a   : > { %s3077_s27 = smov (%p50_p8, %s48_s27), 0  ;;  %p70_p12 = scmp.ne.s32.totalorder %s2392_s18, %s2388_s17 }
  0x8b   : > { %3041 = sst [smem:[#allocation24_spill]] %s3077_s27  ;;  %p2649_p11 = por %p65_p3, %p64_p1 }
  0x8c   : > { %s52_s14 = ssub.s32 %s2404_s21, %s3077_s27  ;;  %p290_p6 = scmp.eq.s32.totalorder %s2516_s23, 1 }
  0x8d   : > { %p55_p13 = scmp.eq.s32.totalorder %s52_s14, 0  ;;  %p3043_p0 = scmp.eq.s32.totalorder %s2516_s23, 0 }
  0x8e   : > { %p2664_p4 = por %p290_p6, %p64_p1  ;;  %p296_p7 = scmp.eq.s32.totalorder %s1765_s10, 1 }
  0x8f   : > { %p2660_p2 = por %p3043_p0, %p70_p12  ;;  %p2025_p5 = scmp.lt.s32.totalorder %s2408_s22, 2 }
  0x90   : > { %s3045_s11 = scalar_select %p2664_p4, 1, 0 }
  0x91   : > { %s3044_s15 = scalar_select %p2660_p2, 1, 0 }
  0x92   : > { %s2669_s16 = scalar_select %p55_p13, %s2396_s19, %s57_s9  }
  0x93   : > { %p2671_p9 = por %p296_p7, %p70_p12  ;;  %s408_s28 = sand.u32 1, %s2396_s19  }
  0x94   : > { %s1773_s30 = sshll.u32 %s2404_s21, 7  ;;  %s2678_s13 = sshll.u32 %s408_s28, 3 }
  0x95   : > { %s3046_s25 = scalar_select %p2671_p9, 1, 0 }
  0x96   : > { %s2683_s29 = scalar_lea.hbm %s3005_s0, %s1773_s30  ;;  %s412_s7 = scalar_lea.vmem [#allocation2], %s2678_s13 }
  0x97   : > { %s420_s10 = sshll.u32 %s412_s7, 4  ;;  %p2688_p10 = pnand %p2025_p5, %p2649_p11  ;;  %s2692_s10 = int_to_ptr.vmem [resolvable:$true] %s420_s10 }
  0x98   : > { %s2697_s12 = scalar_lea.hbm %s3006_s1, %s1773_s30  ;;  %s409_s2 = scalar_lea.sflag [#allocation3], %s408_s28 }
  0x99   : > { %s2218_s4 = scalar_lea.hbm %s2683_s29, 128  ;;  %p2220_p1 = pneg %p2688_p10 }
  0x9a   : > { %p2219_p8 = scmp.ne.s32.totalorder %s2683_s29, %s2218_s4  ;;  %s2223_s6 = scalar_lea.hbm %s3005_s0, 256 }
  0x9b   : > { %p2224_p12 = scmp.lt.u32.totalorder %s2683_s29, %s3005_s0  ;;  %p2225_p6 = scmp.lt.u32.totalorder %s2223_s6, %s2218_s4 }
  0x9c   : > { %p2221_p3 = pnand %p2220_p1, %p2219_p8  ;;  %p2227_p0 = scmp.lt.u32.totalorder %s2218_s4, %s2683_s29 }
  0x9d   : > { %p2226_p13 = por %p2225_p6, %p2224_p12 }
  0x9e   : > { %p2222_p11 = pneg %p2221_p3 }
  0x9f   : > { %p2228_p7 = por %p2227_p0, %p2226_p13 }
  0xa1   : > { %p2229_p5 = pnand %p2228_p7, %p2222_p11 }
  0xa3   : > { %2232 = shalt.err (!%p2229_p5)
}
  0xa4   : > { %s2233_s28 = scalar_lea.vmem %s2692_s10, 128  ;;  %s2416_s30 = smov [#allocation2]  }
  0xa5   : > { %p2234_p8 = scmp.ne.s32.totalorder %s2692_s10, %s2233_s28  ;;  %s2238_s14 = sshll.u32 %s2416_s30, 4  ;;  %s2239_s14 = int_to_ptr.vmem [resolvable:$false] %s2238_s14 }
  0xa6   : > { %s2240_s8 = scalar_lea.vmem %s2239_s14, 256  ;;  %p2241_p4 = scmp.lt.s32.totalorder %s2692_s10, %s2239_s14 }
  0xa7   : > { %p2236_p3 = pnand %p2234_p8, %p2220_p1  ;;  %p2242_p12 = scmp.lt.s32.totalorder %s2240_s8, %s2233_s28 }
  0xa9   : > { %p2237_p9 = pneg %p2236_p3  ;;  %p2243_p6 = por %p2242_p12, %p2241_p4 }
  0xab   : > { %p2244_p13 = pnand %p2243_p6, %p2237_p9 }
  0xad   : > { %2247 = shalt.err (!%p2244_p13)
}
  0xae   : > { %2010 = dma.hbm_to_vmem [thread:$0]  (!%p2688_p10), %s2683_s29, 128, %s2692_s10, %s409_s2  }
  0xaf   : > { %s427_s4 = sand.u32 1, %s2408_s22   ;;  %s431_s6 = scalar_lea.vmem [#allocation5], %s2678_s13 }
  0xb0   : > { %s438_s27 = sshll.u32 %s431_s6, 4  ;;  %s428_s26 = scalar_lea.sflag [#allocation6], %s427_s4  ;;  %s439_s27 = int_to_ptr.vmem [resolvable:$true] %s438_s27 }
  0xb1   : > { %s2248_s20 = scalar_lea.hbm %s2697_s12, 128  ;;  %s2253_s30 = scalar_lea.hbm %s3006_s1, 256 }
  0xb2   : > { %p2249_p4 = scmp.ne.s32.totalorder %s2697_s12, %s2248_s20  ;;  %p2254_p0 = scmp.lt.u32.totalorder %s2697_s12, %s3006_s1 }
  0xb3   : > { %p2255_p7 = scmp.lt.u32.totalorder %s2253_s30, %s2248_s20  ;;  %p2257_p8 = scmp.lt.u32.totalorder %s2248_s20, %s2697_s12 }
  0xb4   : > { %p2251_p9 = pnand %p2249_p4, %p2220_p1 }
  0xb5   : > { %p2256_p5 = por %p2255_p7, %p2254_p0 }
  0xb6   : > { %p2252_p11 = pneg %p2251_p9 }
  0xb7   : > { %p2258_p3 = por %p2257_p8, %p2256_p5 }
  0xb9   : > { %p2259_p12 = pnand %p2258_p3, %p2252_p11 }
  0xbb   : > { %2262 = shalt.err (!%p2259_p12)
}
  0xbc   : > { %s2263_s2 = scalar_lea.vmem %s439_s27, 128  ;;  %s2417_s13 = smov [#allocation5]  }
  0xbd   : > { %p2264_p6 = scmp.ne.s32.totalorder %s439_s27, %s2263_s2  ;;  %s2268_s29 = sshll.u32 %s2417_s13, 4  ;;  %s2269_s29 = int_to_ptr.vmem [resolvable:$false] %s2268_s29 }
  0xbe   : > { %s2270_s10 = scalar_lea.vmem %s2269_s29, 256  ;;  %p2271_p9 = scmp.lt.s32.totalorder %s439_s27, %s2269_s29 }
  0xbf   : > { %p2266_p13 = pnand %p2264_p6, %p2220_p1  ;;  %p2272_p2 = scmp.lt.s32.totalorder %s2270_s10, %s2263_s2 }
  0xc1   : > { %p2267_p4 = pneg %p2266_p13  ;;  %p2273_p0 = por %p2272_p2, %p2271_p9 }
  0xc3   : > { %p2274_p7 = pnand %p2273_p0, %p2267_p4 }
  0xc5   : > { %2277 = shalt.err (!%p2274_p7)
}
  0xc6   : > { %2013 = dma.hbm_to_vmem [thread:$0]  (!%p2688_p10), %s2697_s12, 128, %s439_s27, %s428_s26  }
  0xc7   : > { %p3048_p11 = scmp.ne.s32.totalorder %s3034_s24, 0 }
  0xc8   : > { %s2748_s4 = sand.u32 (!%p3048_p11), 1, %s2392_s18   ;;  %p3049_p2 = scmp.ne.s32.totalorder (!%p3048_p11), %s3044_s15, 0 }
  0xc9   : > { %447 = sbr.rel (%p3048_p11) target bundleno = 1447 (0x5a7), region = 60  ;;  %s2751_s6 = sshll.u32 (!%p3048_p11), %s2748_s4, 3 }
  0xca   : > { %s450_s20 = scalar_lea.sflag (!%p3048_p11), [#allocation3], %s2748_s4  ;;  %s453_s7 = scalar_lea.vmem (!%p3048_p11), [#allocation2], %s2751_s6 }
  0xd0   : > { %2359 = dma.done.wait (%p3049_p2), %s450_s20, 128  }
  0xd1   : > { %2361 = vsyncadd (%p3049_p2), %s450_s20, 4294967168  ;;  %s458_s24 = sand.u32 1, %s2516_s23   ;;  %s462_s12 = scalar_lea.vmem [#allocation5], %s2751_s6 }
  0xd2   : > { %s459_s9 = scalar_lea.sflag [#allocation6], %s458_s24 }
  0xd3   : > { %2363 = dma.done.wait (%p3049_p2), %s459_s9, 128  }
  0xd4   : > { %2365 = vsyncadd (%p3049_p2), %s459_s9, 4294967168  ;;  %p3050_p10 = scmp.eq.s32.totalorder %s2516_s23, 0 }
  0xd6   : > { %2367 = dma.done.wait (%p3050_p10), [#allocation6], 512   ;;  %p3051_p1 = pmov %p3050_p10 }
  0xd8   : > { %2369 = vsyncadd (%p3051_p1), [#allocation6], 4294966784  ;;  %p3052_p5 = pmov %p3051_p1 }
  0xd9   : > { %p3053_p8 = pmov %p3051_p1 }
  0xda   : > { %2371 = dma.done.wait (%p3052_p5), [#allocation9], 1024  }
  0xdb   : > { %2373 = vsyncadd (%p3053_p8), [#allocation9], 4294966272  ;;  %p3054_p3 = pmov %p3051_p1 }
  0xdc   : > { %p3055_p12 = pmov %p3051_p1 }
  0xdd   : > { %2375 = dma.done.wait (%p3054_p3), [#allocation12], 512  }
  0xde   : > { %2377 = vsyncadd (%p3055_p12), [#allocation12], 4294966784  ;;  %v2418_v0 = vmov 0.0|0.0   ;;  %vm2419_vm0 = vmmov 0   ;;  %v2420_v1 = vmov 0.0   ;;  %v614_v2 = vld [vmem:[#allocation8] sm:$0xff]  ;;  %v779_v16 = vlaneseq }
  0xdf   : > { %1946 = vmatprep.subr.bf16.mxu1 %v2418_v0  ;;  %1940 = vmatprep.subr.bf16.mxu0 %v2418_v0  ;;  %v615_v3 = vld [vmem:[#allocation8 + $0x8] sm:$0xff]  ;;  %v529_v4 = vld [vmem:[#allocation7] sm:$0xff]  ;;  %v616_v7 = vld [vmem:[#allocation8 + $0x10] sm:$0xff]  ;;  %vm540_vm1 = vcmask 261120   ;;  %vm866_vm12 = vcmask 64512   ;;  %s3062_s14 = sld [smem:[#allocation28_spill]] }
  0xe0   : > { %1875 = vmatprep.mubr.msk.f32.mxu1 %vm2419_vm0, %v2420_v1  ;;  %1864 = vmatprep.mubr.msk.f32.mxu0 %vm2419_vm0, %v2420_v1  ;;  %v1947_v5 = vpack.c.bf16 %v615_v3, %v614_v2  ;;  %v530_v6 = vld [vmem:[#allocation7 + $0x8] sm:$0xff]  ;;  %v617_v8 = vld [vmem:[#allocation8 + $0x18] sm:$0xff]  ;;  %v531_v10 = vld [vmem:[#allocation7 + $0x10] sm:$0xff]  ;;  %v2800_v17 = vand.u32 127, %v779_v16  ;;  %s1784_s8 = sshll.u32 %s2748_s4, 5  ;;  %s3063_s13 = sld [smem:[#allocation23_spill]] }
  0xe1   : > { %v1941_v9 = vpack.c.bf16 %v530_v6, %v529_v4  ;;  %v532_v11 = vld [vmem:[#allocation7 + $0x18] sm:$0xff]  ;;  %v1950_v12 = vpack.c.bf16 %v617_v8, %v616_v7  ;;  %v527_v15 = vld [vmem:[%s453_s7] sm:$0xff]  ;;  %v700_v39 = vld [vmem:[#allocation10 + $0x10] sm:$0xff]  ;;  %s2885_s2 = scalar_lea.vmem [#allocation14], %s1784_s8  ;;  %s3064_s24 = sld [smem:[#allocation32_spill]] }
  0xe2   : > { %1948 = vmatpush3.bf16.msra.mxu1 %v1947_v5  ;;  %v1944_v13 = vpack.c.bf16 %v532_v11, %v531_v10  ;;  %v2787_v14 = vld [vmem:[%s462_s12] sm:$0xff]  ;;  %v1787_v18 = vld [vmem:[%s3010_s5] ss:$0 sm:$0xff]  ;;  %vm782_vm2 = vcmp.lt.s32.totalorder %v2800_v17, 8  ;;  %vm879_vm3 = vcmp.ge.s32.totalorder %v2800_v17, 8  ;;  %vm880_vm4 = vcmp.lt.s32.totalorder %v2800_v17, 16 }
  0xe3   : > { %1942 = vmatpush3.bf16.msra.mxu0 %v1941_v9  ;;  %1949 = vmatprep.subr.bf16.mxu1 %v2418_v0  ;;  %v1785_v19 = vld [vmem:[%s3008_s3] ss:$0 sm:$0xff]  ;;  %vm2816_vm5 = vmand %vm879_vm3, %vm880_vm4  ;;  %vm1123_vm6 = vcmp.ge.s32.totalorder %v2800_v17, 16  ;;  %vm1124_vm7 = vcmp.lt.s32.totalorder %v2800_v17, 24  ;;  %vm1295_vm9 = vcmp.ge.s32.totalorder %v2800_v17, 24  ;;  %vm1296_vm10 = vcmp.lt.s32.totalorder %v2800_v17, 32 }
  0xe4   : > { %1943 = vmatprep.subr.bf16.mxu0 %v2418_v0  ;;  %vm2829_vm8 = vmand %vm1123_vm6, %vm1124_vm7  ;;  %v698_v37 = vld [vmem:[#allocation10] sm:$0xff]  ;;  %v699_v38 = vld [vmem:[#allocation10 + $0x8] sm:$0xff]  ;;  %s1586_s10 = sshll.u32 %s2885_s2, 4  ;;  %s1558_s12 = scalar_lea.sflag [#allocation15], %s2748_s4  ;;  %s2921_s10 = int_to_ptr.vmem [resolvable:$true] %s1586_s10 }
  0xe5   : > { %vm2844_vm11 = vmand %vm1295_vm9, %vm1296_vm10  ;;  %v1953_v40 = vpack.c.bf16 %v699_v38, %v698_v37  ;;  %v701_v41 = vld [vmem:[#allocation10 + $0x18] sm:$0xff]  ;;  %s2278_s23 = scalar_lea.vmem %s2921_s10, 512  ;;  %p3065_p13 = scmp.ne.s32.totalorder %s3045_s11, 0 }
  0xe6   : > { %1951 = vmatpush3.bf16.msra.mxu1 %v1950_v12  ;;  %v1956_v42 = vpack.c.bf16 %v701_v41, %v700_v39  ;;  %s1819_s29 = sshll.u32 %s3063_s13, 9  ;;  %p2279_p6 = scmp.ne.s32.totalorder %s2921_s10, %s2278_s23 }
  0xe7   : > { %1945 = vmatpush3.bf16.msra.mxu0 %v1944_v13  ;;  %1889 = vmatprep.subr.mxu1 %v2420_v1  ;;  %s2919_s9 = scalar_lea.hbm %s3064_s24, %s1819_s29  ;;  %s2421_s15 = smov [#allocation14]  }
  0xe8   : > { %1952 = vmatprep.subr.bf16.mxu0 %v2418_v0  ;;  %p2280_p4 = pnand %p2279_p6, %p3065_p13  ;;  %s2282_s27 = sshll.u32 %s2421_s15, 4  ;;  %s2283_s27 = int_to_ptr.vmem [resolvable:$false] %s2282_s27 }
  0xe9   : > { %1876 = vmatmul.mubr.msk.f32.vlgmr.msra.gmra.mrb[0].mxu1 %vm540_vm1, %v2787_v14  ;;  %s2284_s26 = scalar_lea.vmem %s2283_s27, 1024  ;;  %p2285_p0 = scmp.lt.s32.totalorder %s2921_s10, %s2283_s27 }
  0xea   : > { %1865 = vmatmul.mubr.msk.f32.vlgmr.msra.gmra.mrb[0].mxu0 %vm540_vm1, %v527_v15  ;;  %1891 = vmatprep.mubr.msk.f32.mxu1 %vm2419_vm0, %v2420_v1  ;;  %p2281_p9 = pneg %p2280_p4  ;;  %p2286_p7 = scmp.lt.s32.totalorder %s2284_s26, %s2278_s23 }
  0xeb   : > { %1886 = vmatprep.mubr.msk.f32.mxu0 %vm2419_vm0, %v2420_v1  ;;  %1954 = vmatpush3.bf16.msra.mxu0 %v1953_v40 }
  0xec   : > { %1955 = vmatprep.subr.bf16.mxu0 %v2418_v0  ;;  %p2287_p11 = por %p2286_p7, %p2285_p0 }
  0xee   : > { %p2288_p2 = pnand %p2287_p11, %p2281_p9 }
  0xef   : > { %1957 = vmatpush3.bf16.msra.mxu0 %v1956_v42 }
  0xf0   : > { %1899 = vmatprep.subr.mxu0 %v2420_v1 }
  0xf2   : > { %1887 = vmatmul.mubr.msk.f32.vlgmr.msra.gmra.mrb[2].mxu0 %vm540_vm1, %v2787_v14 }
  0xf3   : > { %1901 = vmatprep.mubr.msk.f32.mxu0 %vm2419_vm0, %v2420_v1 }
 0x1bc   : > { %v694_v20 = vpop.f32.mrb[0].mxu1 }
 0x1bd   : > { %v695_v21 = vadd.f32 %v1787_v18, %v694_v20  ;;  %v1877_v22 = vpop.f32.mrb[1].mxu1  ;;  %v610_v23 = vpop.f32.mrb[0].mxu0  ;;  %v1789_v18 = vld [vmem:[%s3062_s14] ss:$0 sm:$0xff] }
 0x1be   : > { %v611_v24 = vadd.f32 %v1785_v19, %v610_v23  ;;  %v1866_v25 = vpop.f32.mrb[1].mxu0  ;;  %v1467_v22 = vld [vmem:[#allocation11] sm:$0xff]  ;;  %v1468_v23 = vld [vmem:[#allocation11 + $0x8] sm:$0xff] }
 0x1bf   : > { %v787_v26 = vsel %vm782_vm2, %v695_v21, 0.0  ;;  %v885_v29 = vsel %vm2816_vm5, %v695_v21, 0.0  ;;  %v1129_v32 = vsel %vm2829_vm8, %v695_v21, 0.0  ;;  %v1301_v35 = vsel %vm2844_vm11, %v695_v21, 0.0 }
 0x1c0   : > { %1890 = vmatpush3.xpose.msk.msra.mxu1 %vm540_vm1, %v787_v26  ;;  %v786_v27 = vsel %vm782_vm2, %v611_v24, 0.0  ;;  %v884_v31 = vsel %vm2816_vm5, %v611_v24, 0.0  ;;  %v1128_v34 = vsel %vm2829_vm8, %v611_v24, 0.0  ;;  %v1300_v36 = vsel %vm2844_vm11, %v611_v24, 0.0  ;;  %v1469_v24 = vld [vmem:[#allocation11 + $0x10] sm:$0xff]  ;;  %v1470_v26 = vld [vmem:[#allocation11 + $0x18] sm:$0xff] }
 0x1c1   : > { %1894 = vmatprep.subr.mxu1 %v2420_v1  ;;  %v1959_v25 = vpack.c.bf16 %v1468_v23, %v1467_v22 }
 0x1c3   : > { %1892 = vmatmul.mubr.msk.f32.vlgmr.msra.gmra.mrb[2].mxu1 %vm540_vm1, %v786_v27  ;;  %v1962_v27 = vpack.c.bf16 %v1470_v26, %v1469_v24 }
 0x1c4   : > { %1895 = vmatpush3.xpose.msk.msra.mxu1 %vm540_vm1, %v885_v29  ;;  %1896 = vmatprep.mubr.msk.f32.mxu1 %vm2419_vm0, %v2420_v1 }
 0x1c5   : > { %1909 = vmatprep.subr.mxu1 %v2420_v1  ;;  %v775_v19 = vpop.f32.mrb[2].mxu0 }
 0x1c6   : > { %v776_v20 = vadd.f32 %v1789_v18, %v775_v19  ;;  %v1888_v21 = vpop.f32.mrb[3].mxu0 }
 0x1c7   : > { %1897 = vmatmul.mubr.msk.f32.vlgmr.msra.gmra.mrb[4].mxu1 %vm540_vm1, %v884_v31 }
 0x1c8   : > { %1910 = vmatpush3.xpose.msk.msra.mxu1 %vm540_vm1, %v1129_v32  ;;  %1911 = vmatprep.mubr.msk.f32.mxu1 %vm2419_vm0, %v2420_v1 }
 0x1c9   : > { %1919 = vmatprep.subr.mxu1 %v2420_v1  ;;  %1900 = vmatpush3.msk.msra.mxu0 %vm2816_vm5, %v776_v20 }
 0x1ca   : > { %1904 = vmatprep.subr.mxu0 %v2420_v1 }
 0x1cb   : > { %1912 = vmatmul.mubr.msk.f32.vlgmr.msra.gmra.mrb[6].mxu1 %vm540_vm1, %v1128_v34 }
 0x1cc   : > { %1920 = vmatpush3.xpose.msk.msra.mxu1 %vm540_vm1, %v1301_v35  ;;  %1921 = vmatprep.mubr.msk.f32.mxu1 %vm2419_vm0, %v2420_v1 }
 0x1cd   : > { %1958 = vmatprep.subr.bf16.mxu1 %v2418_v0 }
 0x1cf   : > { %1922 = vmatmul.mubr.msk.f32.vlgmr.msra.gmra.mrb[8].mxu1 %vm540_vm1, %v1300_v36 }
 0x1d0   : > { %1937 = vmatprep.mubr.msk.f32.mxu1 %vm2419_vm0, %v2420_v1  ;;  %1960 = vmatpush3.bf16.msra.mxu1 %v1959_v25 }
 0x1d1   : > { %1961 = vmatprep.subr.bf16.mxu1 %v2418_v0 }
 0x1d4   : > { %1963 = vmatpush3.bf16.msra.mxu1 %v1962_v27 }
 0x296   : > { %v861_v43 = vpop.f32.mrb[2].mxu1 }
 0x297   : > { %v1893_v44 = vpop.f32.mrb[3].mxu1  ;;  %v865_v48 = vmul.f32 0.35355338, %v861_v43 }
 0x299   : > { %v867_v53 = vsel %vm866_vm12, %v865_v48, -inf }
 0x29a   : > { %v959_v45 = vpop.f32.mrb[4].mxu1 }
 0x29b   : > { %v963_v46 = vmul.f32 0.35355338, %v959_v45  ;;  %v1898_v47 = vpop.f32.mrb[5].mxu1 }
 0x29d   : > { %v964_v49 = vsel %vm866_vm12, %v963_v46, -inf }
 0x29e   : > { %965 = vmax.xlane.f32.xlu0 %v964_v49  ;;  %v1203_v50 = vpop.f32.mrb[6].mxu1 }
 0x29f   : > { %v1207_v51 = vmul.f32 0.35355338, %v1203_v50  ;;  %v1913_v52 = vpop.f32.mrb[7].mxu1 }
 0x2a1   : > { %v1208_v54 = vsel %vm866_vm12, %v1207_v51, -inf }
 0x2a2   : > { %868 = vmax.xlane.f32.xlu0 %v867_v53  ;;  %1209 = vmax.xlane.f32.xlu1 %v1208_v54  ;;  %v1375_v55 = vpop.f32.mrb[8].mxu1 }
 0x2a3   : > { %v1379_v56 = vmul.f32 0.35355338, %v1375_v55  ;;  %v1923_v57 = vpop.f32.mrb[9].mxu1 }
 0x2a5   : > { %v1380_v58 = vsel %vm866_vm12, %v1379_v56, -inf }
 0x2a6   : > { %1381 = vmax.xlane.f32.xlu1 %v1380_v58 }
 0x32b   : > { %v966_v59 = vpop.xlane.xlu0 %965 }
 0x32c   : > { %v967_v60 = vsub.f32 %v963_v46, %v966_v59 }
 0x32e   : > { %v968_v61 = vmul.f32 1.442695, %v967_v60 }
 0x32f   : > { %v869_v62 = vpop.xlane.xlu0 %868  ;;  %v1210_v63 = vpop.xlane.xlu1 %1209 }
 0x330   : > { %2090 = vpow2.f32 %v968_v61  ;;  %v870_v2 = vsub.f32 %v865_v48, %v869_v62  ;;  %v1211_v3 = vsub.f32 %v1207_v51, %v1210_v63 }
 0x332   : > { %v871_v4 = vmul.f32 1.442695, %v870_v2  ;;  %v1212_v5 = vmul.f32 1.442695, %v1211_v3 }
 0x333   : > { %v1382_v6 = vpop.xlane.xlu1 %1381 }
 0x334   : > { %2092 = vpow2.f32 %v871_v4  ;;  %v1383_v7 = vsub.f32 %v1379_v56, %v1382_v6 }
 0x335   : > { %2094 = vpow2.f32 %v1212_v5 }
 0x336   : > { %v1384_v8 = vmul.f32 1.442695, %v1383_v7 }
 0x338   : > { %2096 = vpow2.f32 %v1384_v8 }
 0x33a   : > { %v2091_v9 = vpop.eup %2090 }
 0x33b   : > { %v970_v10 = vsel %vm866_vm12, %v2091_v9, 0.0 }
 0x33c   : > { %971 = vadd.xlane.f32.xlu0 %v970_v10 }
 0x33e   : > { %v2093_v11 = vpop.eup %2092 }
 0x33f   : > { %v2095_v12 = vpop.eup %2094  ;;  %v873_v13 = vsel %vm866_vm12, %v2093_v11, 0.0 }
 0x340   : > { %v1214_v14 = vsel %vm866_vm12, %v2095_v12, 0.0  ;;  %874 = vadd.xlane.f32.xlu1 %v873_v13 }
 0x341   : > { %1215 = vadd.xlane.f32.xlu0 %v1214_v14 }
 0x342   : > { %v2097_v15 = vpop.eup %2096 }
 0x343   : > { %v1386_v16 = vsel %vm866_vm12, %v2097_v15, 0.0 }
 0x344   : > { %1387 = vadd.xlane.f32.xlu1 %v1386_v16 }
 0x3c9   : > { %v972_v29 = vpop.xlane.xlu0 %971 }
 0x3ca   : > { %2098 = vrcp.f32 %v972_v29 }
 0x3cd   : > { %v875_v31 = vpop.xlane.xlu1 %874 }
 0x3ce   : > { %v1216_v32 = vpop.xlane.xlu0 %1215  ;;  %2100 = vrcp.f32 %v875_v31 }
 0x3cf   : > { %2102 = vrcp.f32 %v1216_v32 }
 0x3d1   : > { %v1388_v28 = vpop.xlane.xlu1 %1387 }
 0x3d2   : > { %2104 = vrcp.f32 %v1388_v28 }
 0x3d4   : > { %v2099_v34 = vpop.eup %2098 }
 0x3d5   : > { %v974_v35 = vmul.f32 %v2099_v34, %v2091_v9 }
 0x3d7   : > { %1795 = vst.msk [vmem:[%s2885_s2 + $0x8] sm:$0xff] %vm866_vm12, %v974_v35  ;;  %1902 = vmatmul.mubr.msk.f32.vlgmr.msra.gmra.mrb[4].mxu0 %vm866_vm12, %v974_v35 }
 0x3d8   : > { %v2101_v0 = vpop.eup %2100  ;;  %1905 = vmatpush3.msk.msra.mxu0 %vm782_vm2, %v776_v20  ;;  %1906 = vmatprep.mubr.msk.f32.mxu0 %vm2419_vm0, %v2420_v1 }
 0x3d9   : > { %v2103_v36 = vpop.eup %2102  ;;  %v877_v37 = vmul.f32 %v2101_v0, %v2093_v11  ;;  %1914 = vmatprep.subr.mxu0 %v2420_v1 }
 0x3da   : > { %v1218_v38 = vmul.f32 %v2103_v36, %v2095_v12 }
 0x3db   : > { %878 = vst.msk [vmem:[%s2885_s2] sm:$0xff] %vm866_vm12, %v877_v37 }
 0x3dc   : > { %v2105_v39 = vpop.eup %2104  ;;  %1802 = vst.msk [vmem:[%s2885_s2 + $0x10] sm:$0xff] %vm866_vm12, %v1218_v38 }
 0x3dd   : > { %v1390_v40 = vmul.f32 %v2105_v39, %v2097_v15 }
 0x3df   : > { %1807 = vst.msk [vmem:[%s2885_s2 + $0x18] sm:$0xff] %vm866_vm12, %v1390_v40  ;;  %1907 = vmatmul.mubr.msk.f32.vlgmr.msra.gmra.mrb[4].mxu0 %vm866_vm12, %v877_v37 }
 0x3e0   : > { %1915 = vmatpush3.msk.msra.mxu0 %vm2829_vm8, %v776_v20  ;;  %1916 = vmatprep.mubr.msk.f32.mxu0 %vm2419_vm0, %v2420_v1 }
 0x3e1   : > { %1924 = vmatprep.subr.mxu0 %v2420_v1 }
 0x3e7   : > { %1917 = vmatmul.mubr.msk.f32.vlgmr.msra.gmra.mrb[4].mxu0 %vm866_vm12, %v1218_v38 }
 0x3e8   : > { %1925 = vmatpush3.msk.msra.mxu0 %vm2844_vm11, %v776_v20  ;;  %1926 = vmatprep.mubr.msk.f32.mxu0 %vm2419_vm0, %v2420_v1 }
 0x3ef   : > { %1927 = vmatmul.mubr.msk.f32.vlgmr.msra.gmra.mrb[4].mxu0 %vm866_vm12, %v1390_v40 }
 0x4c2   : > { %v1462_v17 = vpop.f32.mrb[4].mxu0 }
 0x4c3   : > { %v1928_v41 = vpop.f32.mrb[5].mxu0  ;;  %1938 = vmatmul.mubr.msk.f32.vlgmr.msra.gmra.mrb[10].mxu1 %vm540_vm1, %v1462_v17 }
 0x4c4   : > { %2291 = shalt.err (!%p2288_p2)
}
 0x4c5   : > { %s2292_s28 = scalar_lea.hbm %s2919_s9, 512  ;;  %s2296_s8 = scalar_lea.hbm %s3064_s24, 1024 }
 0x4c6   : > { %p2293_p10 = scmp.ne.s32.totalorder %s2919_s9, %s2292_s28  ;;  %p2297_p8 = scmp.lt.u32.totalorder %s2919_s9, %s3064_s24 }
 0x4c7   : > { %p2298_p3 = scmp.lt.u32.totalorder %s2296_s8, %s2292_s28  ;;  %p2300_p6 = scmp.lt.u32.totalorder %s2292_s28, %s2919_s9 }
 0x4c8   : > { %p2294_p1 = pnand %p2293_p10, %p3065_p13 }
 0x4c9   : > { %p2299_p12 = por %p2298_p3, %p2297_p8 }
 0x4ca   : > { %p2295_p5 = pneg %p2294_p1 }
 0x4cb   : > { %p2301_p4 = por %p2300_p6, %p2299_p12 }
 0x4cd   : > { %p2302_p9 = pnand %p2301_p4, %p2295_p5 }
 0x4cf   : > { %2305 = shalt.err (!%p2302_p9)
}
 0x4d0   : > { %s2422_s20 = smov 128   ;;  %s2423_s7 = smov 8  }
 0x4d1   : > { %1991 = dma.vmem_to_hbm [thread:$0]  (%p3065_p13), %s2921_s10, 512, %s2919_s9, %s1558_s12, %s2422_s20, %s2422_s20, %s2423_s7  }
 0x4d2   : > { %s3066_s27 = sld [smem:[#allocation30_spill]]  ;;  %s1814_s26 = sshll.u32 %s3063_s13, 7 }
 0x4d3   : > { %s519_s28 = scalar_lea.vmem [#allocation13], %s2751_s6  ;;  %s3067_s2 = sld [smem:[#allocation31_spill]] }
 0x4d4   : > { %s1572_s30 = sshll.u32 %s519_s28, 4  ;;  %s1553_s10 = scalar_lea.sflag [#allocation4], %s2748_s4  ;;  %s2957_s30 = int_to_ptr.vmem [resolvable:$true] %s1572_s30 }
 0x4d5   : > { %s2306_s9 = scalar_lea.vmem %s2957_s30, 128  ;;  %s2424_s6 = smov [#allocation13]  }
 0x4d6   : > { %p2307_p0 = scmp.ne.s32.totalorder %s2957_s30, %s2306_s9  ;;  %s2310_s13 = sshll.u32 %s2424_s6, 4  ;;  %s2311_s13 = int_to_ptr.vmem [resolvable:$false] %s2310_s13 }
 0x4d7   : > { %s2312_s12 = scalar_lea.vmem %s2311_s13, 256  ;;  %p2313_p2 = scmp.lt.s32.totalorder %s2957_s30, %s2311_s13 }
 0x4d8   : > { %v1810_v1 = vld [vmem:[%s3066_s27] ss:$0 sm:$0xff]  ;;  %p2308_p7 = pnand %p2307_p0, %p3065_p13  ;;  %p2314_p10 = scmp.lt.s32.totalorder %s2312_s12, %s2306_s9 }
 0x4d9   : > { %s2955_s29 = scalar_lea.hbm %s3067_s2, %s1814_s26 }
 0x4da   : > { %p2309_p11 = pneg %p2308_p7  ;;  %p2315_p1 = por %p2314_p10, %p2313_p2 }
 0x4dc   : > { %p2316_p5 = pnand %p2315_p1, %p2309_p11 }
 0x596   : > { %v1547_v30 = vpop.f32.mrb[10].mxu1 }
 0x597   : > { %v1548_v33 = vadd.f32 %v1810_v1, %v1547_v30  ;;  %v1939_v42 = vpop.f32.mrb[11].mxu1 }
 0x599   : > { %1551 = vst.msk [vmem:[%s519_s28] sm:$0xff] %vm540_vm1, %v1548_v33 }
 0x59a   : > { %2319 = shalt.err (!%p2316_p5)
}
 0x59b   : > { %s2320_s4 = scalar_lea.hbm %s2955_s29, 128  ;;  %s2324_s23 = scalar_lea.hbm %s3067_s2, 256 }
 0x59c   : > { %p2321_p8 = scmp.ne.s32.totalorder %s2955_s29, %s2320_s4  ;;  %p2325_p6 = scmp.lt.u32.totalorder %s2955_s29, %s3067_s2 }
 0x59d   : > { %p2326_p4 = scmp.lt.u32.totalorder %s2324_s23, %s2320_s4  ;;  %p2328_p0 = scmp.lt.u32.totalorder %s2320_s4, %s2955_s29 }
 0x59e   : > { %p2322_p3 = pnand %p2321_p8, %p3065_p13 }
 0x59f   : > { %p2327_p9 = por %p2326_p4, %p2325_p6 }
 0x5a0   : > { %p2323_p12 = pneg %p2322_p3 }
 0x5a1   : > { %p2329_p7 = por %p2328_p0, %p2327_p9 }
 0x5a3   : > { %p2330_p11 = pnand %p2329_p7, %p2323_p12 }
 0x5a5   : > { %2333 = shalt.err (!%p2330_p11)
}
 0x5a6   : > { %1990 = dma.vmem_to_hbm [thread:$0]  (%p3065_p13), %s2957_s30, 128, %s2955_s29, %s1553_s10  }
 0x5a7 PF: > { %s1601_s26 = sand.u32 1, %s2388_s17   ;;  %p3068_p2 = scmp.ne.s32.totalorder %s3046_s25, 0 }
 0x5a8   : > { %p3069_p10 = scmp.ge.s32.totalorder %s2408_s22, 2  ;;  %s1602_s28 = scalar_lea.sflag [#allocation4], %s1601_s26 }
 0x5aa   : > { %p2015_p1 = pnand %p3069_p10, %p3068_p2 }
 0x5ac   : > { %2379 = dma.done.wait (!%p2015_p1), %s1602_s28, 128  }
 0x5ad   : > { %2381 = vsyncadd (!%p2015_p1), %s1602_s28, 4294967168  ;;  %s1611_s14 = scalar_lea.sflag [#allocation15], %s1601_s26 }
 0x5ae   : > { %2383 = dma.done.wait (!%p2015_p1), %s1611_s14, 512  }
 0x5af   : > { %2385 = vsyncadd (!%p2015_p1), %s1611_s14, 4294966784  ;;  %s36_s22 = sadd.s32 1, %s2408_s22   ;;  %s3070_s11 = sld [smem:[#allocation24_spill]] }
 0x5b0   : > { %p33_p5 = scmp.ge.s32.totalorder %s36_s22, 4   ;;  %s3071_s17 = smov %s2392_s18 }
 0x5b1   : > { %s3072_s18 = smov %s2396_s19  ;;  %s3073_s19 = smov %s2669_s16 }
 0x5b2   : > { %s3074_s20 = smov %s2404_s21  ;;  %35 = sbr.rel (!%p33_p5) target bundleno = 21 (0x15), region = 154 }
 0x5b5   : > { %s3075_s21 = smov %s3070_s11 }
 0x5b9   :  { %1616 = vsyncpa [#allocation3], 1 }
 0x5ba   :  { %1618 = vsyncpa [#allocation3 + $0x1], 1 }
 0x5bb   :  { %1619 = vsyncpa [#allocation6], 1 }
 0x5bc   :  { %1621 = vsyncpa [#allocation6 + $0x1], 1 }
 0x5bd   :  { %1622 = vsyncpa [#allocation9], 1 }
 0x5be   :  { %1623 = vsyncpa [#allocation12], 1 }
 0x5bf   :  { %1624 = vsyncpa [#allocation4], 1 }
 0x5c0   :  { %1626 = vsyncpa [#allocation4 + $0x1], 1 }
 0x5c1   :  { %1627 = vsyncpa [#allocation15], 1 }
 0x5c2   :  { %1629 = vsyncpa [#allocation15 + $0x1], 1 }

</bundles_post_ra>
